<compile_context>
chip_gen: v7x
topology: tpu7x:2x2x1
jax: 0.10.0
libtpu: 0.0.40
codegen_flags: <defaults>
</compile_context>

<pallas_src>
from functools import partial

import jax
import jax.numpy as jnp
from jax import lax
from jax.experimental import pallas as pl
from jax.experimental.pallas import tpu as pltpu


def _gjr_kernel(pred_ref, target_ref, pos_neg_ref,
                loss_ref, pg_ref, ng_ref,
                negw_sc, deltaw_sc,
                *, gamma, mu, alpha, beta,
                n_rows, block_n, tiles_per_chunk, any_ragged):
    c = pl.program_id(0)   # chunk axis ("parallel", one per TensorCore on v7x)
    j = pl.program_id(1)   # row-tile axis ("arbitrary", reduction)

    @pl.when(j == 0)
    def _init():
        # get_weight(): per-class sigmoid weights, hoisted out of the per-tile
        # loop into (1, C) VMEM scratch.  weight = neg_w + t * delta_w with
        # delta_w = pos_w - neg_w = (1 + alpha) * (1 - neg_w).
        pos_neg = pos_neg_ref[...].astype(jnp.float32)                 # (1, C)
        neg_w = 1.0 / (1.0 + jnp.exp(-gamma * (pos_neg - mu)))
        negw_sc[...] = neg_w
        deltaw_sc[...] = (1.0 + alpha) * (1.0 - neg_w)
        # outputs double as accumulators (constant block index along j)
        loss_ref[...] = jnp.zeros_like(loss_ref)
        pg_ref[...] = jnp.zeros_like(pg_ref)
        ng_ref[...] = jnp.zeros_like(ng_ref)

    neg_w = negw_sc[...]                            # (1, C)
    delta_w = deltaw_sc[...]                        # (1, C)

    pred = pred_ref[...].astype(jnp.float32)        # (block_n, C)
    target = target_ref[...].astype(jnp.float32)    # (block_n, C)

    def tile_sums(pred, target, valid):
        # valid is None on the fast (fully in-bounds) path, else (block_n, 1) bool.
        if valid is not None:
            # Zero masked rows BEFORE any arithmetic so stale/undefined tile
            # tails can never inject Inf/NaN (Inf * 0 = NaN) into the sums.
            pred = jnp.where(valid, pred, 0.0)
            target = jnp.where(valid, target, 0.0)
        weight = neg_w + target * delta_w           # pos_w*t + (1-t)*neg_w
        if valid is not None:
            weight = jnp.where(valid, weight, 0.0)

        # Fused sigmoid + stable BCE-with-logits: one exp, one reciprocal.
        abs_pred = jnp.abs(pred)
        e = jnp.exp(-abs_pred)
        r = 1.0 / (1.0 + e)
        # exact sigmoid on both branches (e*r == e/(1+e), no 1-r cancellation)
        pt = jnp.where(pred >= 0.0, r, e * r)
        diff = jnp.abs(target - pt)
        # collect_grad(): grad = |t*(pt-1) + (1-t)*pt| == |pt - t| == diff
        gw = diff * weight
        bce = jnp.maximum(pred, 0.0) - pred * target + jnp.log1p(e)
        if beta == 2.0:
            loss_elem = bce * (diff * gw)           # bce * diff^2 * weight
        elif beta == 1.0:
            loss_elem = bce * gw
        else:
            loss_elem = bce * (diff ** beta) * weight

        loss_t = jnp.sum(loss_elem, axis=0, keepdims=True)             # (1, C)
        pg_t = jnp.sum(gw * target, axis=0, keepdims=True)             # (1, C)
        ng_t = jnp.sum(gw, axis=0, keepdims=True) - pg_t               # (1, C)
        return loss_t, pg_t, ng_t

    def accumulate(sums):
        loss_t, pg_t, ng_t = sums
        loss_ref[...] += loss_t
        pg_ref[...] += pg_t
        ng_ref[...] += ng_t

    if not any_ragged:
        # Batch is tile-aligned and evenly split: no mask code compiled at all.
        accumulate(tile_sums(pred, target, None))
    else:
        row0 = (c * tiles_per_chunk + j) * block_n
        is_full = row0 + block_n <= n_rows

        @pl.when(is_full)
        def _fast():                                 # interior tiles: mask-free
            accumulate(tile_sums(pred, target, None))

        @pl.when(jnp.logical_not(is_full))
        def _masked():                               # ragged / padded tiles
            row = lax.broadcasted_iota(jnp.int32, (block_n, 1), 0) + row0
            valid = row < n_rows
            accumulate(tile_sums(pred, target, valid))


def gjr_loss(pred, target, pos_grad, neg_grad, pos_neg,
             gamma=12.0, mu=0.8, alpha=4.0, beta=2.0,
             block_n=None, num_chunks=None):
    """Returns (loss_scalar, new_pos_grad, new_neg_grad, new_pos_neg)."""
    n, cdim = pred.shape
    n = int(n)

    # ---- hardware-aware defaults -----------------------------------------
    vmem_cap = 128 * 1024 * 1024
    detected_cores = 1
    try:
        info = pltpu.get_tpu_info()
        vmem_cap = int(getattr(info, "vmem_capacity_bytes", vmem_cap))
        for attr in ("num_cores", "core_count", "tensorcore_count",
                     "num_tensorcores"):
            v = getattr(info, attr, None)
            if v is not None:
                try:
                    v = int(v)
                except Exception:
                    continue
                if 1 <= v <= 16:
                    detected_cores = v
                    break
    except Exception:
        pass

    if num_chunks is None:
        # >1 only helps on multi-TensorCore chips (v7x); serial loop otherwise.
        num_chunks = min(detected_cores, 2)
    num_chunks = max(1, int(num_chunks))

    itemsize = max(jnp.dtype(pred.dtype).itemsize, jnp.dtype(target.dtype).itemsize)
    c_lanes = ((cdim + 127) // 128) * 128
    # 2 inputs x 2 pipeline buffers; budget ~= 1/8 of physical VMEM
    # (16 MiB on v5e/v6e, 8 MiB on v7x's 64 MiB VMEM).
    budget = max(vmem_cap // 8, 2 * 1024 * 1024)
    bytes_per_row = 4 * c_lanes * itemsize
    cap_rows = max(8, (budget // bytes_per_row) // 8 * 8)

    if block_n is None:
        block_n = 4096
    block_n = max(8, (int(block_n) // 8) * 8)
    block_n = min(block_n, cap_rows, ((n + 7) // 8) * 8)

    row_tiles = pl.cdiv(n, block_n)
    num_chunks = max(1, min(num_chunks, row_tiles))

    # Balance the chunk split on multi-TC chips: shrink block_n so the tile
    # count divides evenly, instead of one core running an all-padding tile.
    if num_chunks > 1 and row_tiles % num_chunks != 0:
        t2 = ((row_tiles + num_chunks - 1) // num_chunks) * num_chunks
        bn2 = max(8, ((pl.cdiv(n, t2) + 7) // 8) * 8)
        if pl.cdiv(n, bn2) % num_chunks == 0:
            block_n = bn2
            row_tiles = pl.cdiv(n, block_n)

    tiles_per_chunk = pl.cdiv(row_tiles, num_chunks)
    any_ragged = (n % block_n != 0) or (row_tiles % num_chunks != 0)

    pn = pos_neg.reshape(1, cdim).astype(jnp.float32)

    kernel = partial(_gjr_kernel, gamma=float(gamma), mu=float(mu),
                     alpha=float(alpha), beta=float(beta),
                     n_rows=n, block_n=block_n,
                     tiles_per_chunk=tiles_per_chunk, any_ragged=any_ragged)

    def in_index(c, j):
        t = c * tiles_per_chunk + j
        if any_ragged:
            # keep the DMA block in-bounds for the (fully masked) spill tiles
            t = jnp.minimum(t, row_tiles - 1)
        return (t, 0)

    def nc_spec():
        return pl.BlockSpec((block_n, cdim), in_index)

    def chunk_spec():
        # (num_chunks, 1, C) array, (None, 1, C) block -> kernel sees (1, C)
        return pl.BlockSpec((None, 1, cdim), lambda c, j: (c, 0, 0))

    out_shapes = (
        jax.ShapeDtypeStruct((num_chunks, 1, cdim), jnp.float32),   # loss partials
        jax.ShapeDtypeStruct((num_chunks, 1, cdim), jnp.float32),   # pos_grad partials
        jax.ShapeDtypeStruct((num_chunks, 1, cdim), jnp.float32),   # neg_grad partials
    )

    # Scoped-VMEM: input double-buffers dominate; raise the limit if the chosen
    # tile needs it (covers v5e's 16 MiB default), capped at half physical VMEM.
    vmem_needed = 4 * block_n * c_lanes * itemsize + 32 * c_lanes * 4 + (1 << 20)
    vmem_limit = int(min(max(vmem_cap // 2, 32 * 1024 * 1024),
                         max(32 * 1024 * 1024, vmem_needed + (8 << 20))))

    loss_part, pg_part, ng_part = pl.pallas_call(
        kernel,
        out_shape=out_shapes,
        grid_spec=pltpu.PrefetchScalarGridSpec(
            num_scalar_prefetch=0,
            grid=(num_chunks, tiles_per_chunk),
            in_specs=[nc_spec(), nc_spec(),
                      pl.BlockSpec((1, cdim), lambda c, j: (0, 0))],
            out_specs=(chunk_spec(), chunk_spec(), chunk_spec()),
            scratch_shapes=[pltpu.VMEM((1, cdim), jnp.float32),
                            pltpu.VMEM((1, cdim), jnp.float32)],
        ),
        compiler_params=pltpu.CompilerParams(
            dimension_semantics=("parallel", "arbitrary"),
            vmem_limit_bytes=vmem_limit),
    )(pred, target, pn)

    # Tiny finalize in XLA: cross-chunk reduce, 1/N scale, buffer updates.
    inv_n = 1.0 / float(n)
    loss = jnp.sum(loss_part) * inv_n
    new_pg = pos_grad.astype(jnp.float32) + jnp.sum(pg_part, axis=(0, 1))
    new_ng = neg_grad.astype(jnp.float32) + jnp.sum(ng_part, axis=(0, 1))
    new_pn = new_pg / (new_ng + 1e-10)
    return loss, new_pg, new_ng, new_pn


def _reference(pred, target, pos_grad, neg_grad, pos_neg,
               gamma=12.0, mu=0.8, alpha=4.0, beta=2.0):
    """Pure-JAX reference mirroring the PyTorch forward."""
    n, c = pred.shape
    pred = pred.astype(jnp.float32)
    target = target.astype(jnp.float32)
    neg_w = 1.0 / (1.0 + jnp.exp(-gamma * (pos_neg - mu)))
    pos_w = 1.0 + alpha * (1.0 - neg_w)
    weight = pos_w[None, :] * target + (1.0 - target) * neg_w[None, :]
    pt = jax.nn.sigmoid(pred)
    modulator = jnp.abs(target - pt) ** beta
    bce = jnp.maximum(pred, 0.0) - pred * target + jnp.log1p(jnp.exp(-jnp.abs(pred)))
    loss = jnp.sum(bce * modulator * weight) / n
    grad = jnp.abs(target * (pt - 1.0) + (1.0 - target) * pt)
    new_pg = pos_grad + jnp.sum(grad * target * weight, axis=0)
    new_ng = neg_grad + jnp.sum(grad * (1.0 - target) * weight, axis=0)
    new_pn = new_pg / (new_ng + 1e-10)
    return loss, new_pg, new_ng, new_pn


def _check(out, ref):
    loss, pg, ng, pn = out
    r_loss, r_pg, r_ng, r_pn = ref
    assert jnp.allclose(loss, r_loss, rtol=1e-5, atol=1e-5)
    assert jnp.allclose(pg, r_pg, rtol=1e-5, atol=1e-5)
    assert jnp.allclose(ng, r_ng, rtol=1e-5, atol=1e-5)
    assert jnp.allclose(pn, r_pn, rtol=1e-4, atol=1e-4)


if __name__ == "__main__":
    num_classes = 80
    key = jax.random.PRNGKey(0)
    k_pred, k_tgt, k_pred2, k_tgt2 = jax.random.split(key, 4)

    # Buffers as in __init__: pos_grad=0, neg_grad=0, pos_neg=100
    pos_grad = jnp.zeros((num_classes,), jnp.float32)
    neg_grad = jnp.zeros((num_classes,), jnp.float32)
    pos_neg = jnp.ones((num_classes,), jnp.float32) * 100.0

    # Case 1: batch not tile-aligned -> ragged masked tile + clamped spill tile.
    batch = 20
    pred = jax.random.normal(k_pred, (batch, num_classes), dtype=jnp.float32)
    target = jax.random.bernoulli(k_tgt, p=0.1,
                                  shape=(batch, num_classes)).astype(jnp.float32)
    out1 = gjr_loss(pred, target, pos_grad, neg_grad, pos_neg,
                    block_n=8, num_chunks=2)
    jax.block_until_ready(out1)
    _check(out1, _reference(pred, target, pos_grad, neg_grad, pos_neg))

    # Case 2: fully automatic (hardware-derived) tiling on the same data.
    out2 = gjr_loss(pred, target, pos_grad, neg_grad, pos_neg)
    jax.block_until_ready(out2)
    _check(out2, _reference(pred, target, pos_grad, neg_grad, pos_neg))

    # Case 3: tile-aligned batch -> mask-free fast compile path.
    batch2 = 32
    pred2 = jax.random.normal(k_pred2, (batch2, num_classes), dtype=jnp.float32)
    target2 = jax.random.bernoulli(k_tgt2, p=0.1,
                                   shape=(batch2, num_classes)).astype(jnp.float32)
    out3 = gjr_loss(pred2, target2, pos_grad, neg_grad, pos_neg,
                    block_n=16, num_chunks=2)
    jax.block_until_ready(out3)
    _check(out3, _reference(pred2, target2, pos_grad, neg_grad, pos_neg))

    print("KERNEL_OK")
</pallas_src>

<mosaic_0001>
module attributes {stable_mosaic.version = 11 : i64} {
  func.func @_gjr_kernel(%arg0: i32, %arg1: i32, %arg2: memref<8x80xf32, #tpu.memory_space<vmem>>, %arg3: memref<8x80xf32, #tpu.memory_space<vmem>>, %arg4: memref<1x80xf32, #tpu.memory_space<vmem>>, %arg5: memref<1x1x80xf32, #tpu.memory_space<vmem>>, %arg6: memref<1x1x80xf32, #tpu.memory_space<vmem>>, %arg7: memref<1x1x80xf32, #tpu.memory_space<vmem>>, %arg8: memref<1x80xf32, #tpu.memory_space<vmem>>, %arg9: memref<1x80xf32, #tpu.memory_space<vmem>>) attributes {dimension_semantics = [#tpu.dimension_semantics<parallel>, #tpu.dimension_semantics<arbitrary>], iteration_bounds = array<i64: 2, 2>, scalar_prefetch = 0 : i64, scratch_operands = 2 : i64, tpu.core_type = #tpu.core_type<tc>, window_params = [{transform_indices = @transform_0, window_bounds = array<i64: 8, 80>}, {transform_indices = @transform_1, window_bounds = array<i64: 8, 80>}, {pipeline_mode = #tpu.pipeline_mode<synchronous>, transform_indices = @transform_2, window_bounds = array<i64: 1, 80>}, {transform_indices = @transform_3, window_bounds = array<i64: 1, 1, 80>}, {transform_indices = @transform_4, window_bounds = array<i64: 1, 1, 80>}, {transform_indices = @transform_5, window_bounds = array<i64: 1, 1, 80>}]} {
    %c0_i32 = arith.constant 0 : i32
    %0 = arith.cmpi eq, %arg1, %c0_i32 : i32
    %1 = arith.extui %0 : i1 to i32
    %c0_i32_0 = arith.constant 0 : i32
    %2 = arith.cmpi ne, %1, %c0_i32_0 : i32
    scf.if %2 {
      %c0_11 = arith.constant 0 : index
      %c0_12 = arith.constant 0 : index
      %17 = vector.load %arg4[%c0_11, %c0_12] : memref<1x80xf32, #tpu.memory_space<vmem>>, vector<1x80xf32>
      %cst = arith.constant 8.000000e-01 : f32
      %18 = vector.broadcast %cst : f32 to vector<1x80xf32>
      %19 = arith.subf %17, %18 : vector<1x80xf32>
      %cst_13 = arith.constant -1.200000e+01 : f32
      %20 = vector.broadcast %cst_13 : f32 to vector<1x80xf32>
      %21 = arith.mulf %20, %19 : vector<1x80xf32>
      %22 = math.exp %21 : vector<1x80xf32>
      %cst_14 = arith.constant 1.000000e+00 : f32
      %23 = vector.broadcast %cst_14 : f32 to vector<1x80xf32>
      %24 = arith.addf %23, %22 : vector<1x80xf32>
      %cst_15 = arith.constant 1.000000e+00 : f32
      %25 = vector.broadcast %cst_15 : f32 to vector<1x80xf32>
      %26 = arith.divf %25, %24 : vector<1x80xf32>
      %c0_16 = arith.constant 0 : index
      %c0_17 = arith.constant 0 : index
      %27 = vector.load %arg8[%c0_16, %c0_17] : memref<1x80xf32, #tpu.memory_space<vmem>>, vector<1x80xf32>
      tpu.vector_store %arg8[%c0_16, %c0_17], %26 {strides = array<i32>} : memref<1x80xf32, #tpu.memory_space<vmem>>, vector<1x80xf32>,
      %cst_18 = arith.constant 1.000000e+00 : f32
      %28 = vector.broadcast %cst_18 : f32 to vector<1x80xf32>
      %29 = arith.subf %28, %26 : vector<1x80xf32>
      %cst_19 = arith.constant 5.000000e+00 : f32
      %30 = vector.broadcast %cst_19 : f32 to vector<1x80xf32>
      %31 = arith.mulf %30, %29 : vector<1x80xf32>
      %c0_20 = arith.constant 0 : index
      %c0_21 = arith.constant 0 : index
      %32 = vector.load %arg9[%c0_20, %c0_21] : memref<1x80xf32, #tpu.memory_space<vmem>>, vector<1x80xf32>
      tpu.vector_store %arg9[%c0_20, %c0_21], %31 {strides = array<i32>} : memref<1x80xf32, #tpu.memory_space<vmem>>, vector<1x80xf32>,
      %cst_22 = arith.constant 0.000000e+00 : f32
      %33 = vector.broadcast %cst_22 : f32 to vector<1x80xf32>
      %c0_23 = arith.constant 0 : index
      %c0_24 = arith.constant 0 : index
      %c0_25 = arith.constant 0 : index
      %34 = vector.load %arg5[%c0_23, %c0_24, %c0_25] : memref<1x1x80xf32, #tpu.memory_space<vmem>>, vector<1x1x80xf32>
      %35 = vector.shape_cast %34 : vector<1x1x80xf32> to vector<1x80xf32>
      %36 = vector.shape_cast %33 : vector<1x80xf32> to vector<1x1x80xf32>
      tpu.vector_store %arg5[%c0_23, %c0_24, %c0_25], %36 {strides = array<i32>} : memref<1x1x80xf32, #tpu.memory_space<vmem>>, vector<1x1x80xf32>,
      %cst_26 = arith.constant 0.000000e+00 : f32
      %37 = vector.broadcast %cst_26 : f32 to vector<1x80xf32>
      %c0_27 = arith.constant 0 : index
      %c0_28 = arith.constant 0 : index
      %c0_29 = arith.constant 0 : index
      %38 = vector.load %arg6[%c0_27, %c0_28, %c0_29] : memref<1x1x80xf32, #tpu.memory_space<vmem>>, vector<1x1x80xf32>
      %39 = vector.shape_cast %38 : vector<1x1x80xf32> to vector<1x80xf32>
      %40 = vector.shape_cast %37 : vector<1x80xf32> to vector<1x1x80xf32>
      tpu.vector_store %arg6[%c0_27, %c0_28, %c0_29], %40 {strides = array<i32>} : memref<1x1x80xf32, #tpu.memory_space<vmem>>, vector<1x1x80xf32>,
      %cst_30 = arith.constant 0.000000e+00 : f32
      %41 = vector.broadcast %cst_30 : f32 to vector<1x80xf32>
      %c0_31 = arith.constant 0 : index
      %c0_32 = arith.constant 0 : index
      %c0_33 = arith.constant 0 : index
      %42 = vector.load %arg7[%c0_31, %c0_32, %c0_33] : memref<1x1x80xf32, #tpu.memory_space<vmem>>, vector<1x1x80xf32>
      %43 = vector.shape_cast %42 : vector<1x1x80xf32> to vector<1x80xf32>
      %44 = vector.shape_cast %41 : vector<1x80xf32> to vector<1x1x80xf32>
      tpu.vector_store %arg7[%c0_31, %c0_32, %c0_33], %44 {strides = array<i32>} : memref<1x1x80xf32, #tpu.memory_space<vmem>>, vector<1x1x80xf32>,
    } else {
    }
    %c0 = arith.constant 0 : index
    %c0_1 = arith.constant 0 : index
    %3 = vector.load %arg8[%c0, %c0_1] : memref<1x80xf32, #tpu.memory_space<vmem>>, vector<1x80xf32>
    %c0_2 = arith.constant 0 : index
    %c0_3 = arith.constant 0 : index
    %4 = vector.load %arg9[%c0_2, %c0_3] : memref<1x80xf32, #tpu.memory_space<vmem>>, vector<1x80xf32>
    %c0_4 = arith.constant 0 : index
    %c0_5 = arith.constant 0 : index
    %5 = vector.load %arg2[%c0_4, %c0_5] : memref<8x80xf32, #tpu.memory_space<vmem>>, vector<8x80xf32>
    %c0_6 = arith.constant 0 : index
    %c0_7 = arith.constant 0 : index
    %6 = vector.load %arg3[%c0_6, %c0_7] : memref<8x80xf32, #tpu.memory_space<vmem>>, vector<8x80xf32>
    %c2_i32 = arith.constant 2 : i32
    %7 = arith.muli %arg0, %c2_i32 : i32
    %8 = arith.addi %7, %arg1 : i32
    %c8_i32 = arith.constant 8 : i32
    %9 = arith.muli %8, %c8_i32 : i32
    %c8_i32_8 = arith.constant 8 : i32
    %10 = arith.addi %9, %c8_i32_8 : i32
    %c20_i32 = arith.constant 20 : i32
    %11 = arith.cmpi sle, %10, %c20_i32 : i32
    %12 = arith.extui %11 : i1 to i32
    %c0_i32_9 = arith.constant 0 : i32
    %13 = arith.cmpi ne, %12, %c0_i32_9 : i32
    scf.if %13 {
      %17 = vector.broadcast %4 : vector<1x80xf32> to vector<8x80xf32>
      %18 = arith.mulf %6, %17 : vector<8x80xf32>
      %19 = vector.broadcast %3 : vector<1x80xf32> to vector<8x80xf32>
      %20 = arith.addf %19, %18 : vector<8x80xf32>
      %21 = math.absf %5 : vector<8x80xf32>
      %cst = arith.constant 0.000000e+00 : f32
      %22 = vector.broadcast %cst : f32 to vector<8x80xf32>
      %23 = arith.subf %22, %21 : vector<8x80xf32>
      %24 = math.exp %23 : vector<8x80xf32>
      %cst_11 = arith.constant 1.000000e+00 : f32
      %25 = vector.broadcast %cst_11 : f32 to vector<8x80xf32>
      %26 = arith.addf %25, %24 : vector<8x80xf32>
      %cst_12 = arith.constant 1.000000e+00 : f32
      %27 = vector.broadcast %cst_12 : f32 to vector<8x80xf32>
      %28 = arith.divf %27, %26 : vector<8x80xf32>
      %cst_13 = arith.constant 0.000000e+00 : f32
      %29 = vector.broadcast %cst_13 : f32 to vector<8x80xf32>
      %30 = arith.cmpf oge, %5, %29 : vector<8x80xf32>
      %31 = arith.mulf %24, %28 : vector<8x80xf32>
      %32 = arith.select %30, %28, %31 : vector<8x80xi1>, vector<8x80xf32>
      %33 = arith.subf %6, %32 : vector<8x80xf32>
      %34 = math.absf %33 : vector<8x80xf32>
      %35 = arith.mulf %34, %20 : vector<8x80xf32>
      %cst_14 = arith.constant 0.000000e+00 : f32
      %36 = vector.broadcast %cst_14 : f32 to vector<8x80xf32>
      %37 = arith.maximumf %5, %36 : vector<8x80xf32>
      %38 = arith.mulf %5, %6 : vector<8x80xf32>
      %39 = arith.subf %37, %38 : vector<8x80xf32>
      %40 = math.log1p %24 : vector<8x80xf32>
      %41 = arith.addf %39, %40 : vector<8x80xf32>
      %42 = arith.mulf %34, %35 : vector<8x80xf32>
      %43 = arith.mulf %41, %42 : vector<8x80xf32>
      %cst_15 = arith.constant dense<0.000000e+00> : vector<80xf32>
      %44 = vector.multi_reduction <add>, %43, %cst_15 [0] : vector<8x80xf32> to vector<80xf32>
      %45 = vector.shape_cast %44 : vector<80xf32> to vector<1x80xf32>
      %46 = arith.mulf %35, %6 : vector<8x80xf32>
      %cst_16 = arith.constant dense<0.000000e+00> : vector<80xf32>
      %47 = vector.multi_reduction <add>, %46, %cst_16 [0] : vector<8x80xf32> to vector<80xf32>
      %48 = vector.shape_cast %47 : vector<80xf32> to vector<1x80xf32>
      %cst_17 = arith.constant dense<0.000000e+00> : vector<80xf32>
      %49 = vector.multi_reduction <add>, %35, %cst_17 [0] : vector<8x80xf32> to vector<80xf32>
      %50 = vector.shape_cast %49 : vector<80xf32> to vector<1x80xf32>
      %51 = arith.subf %50, %48 : vector<1x80xf32>
      %c0_18 = arith.constant 0 : index
      %c0_19 = arith.constant 0 : index
      %c0_20 = arith.constant 0 : index
      %52 = vector.load %arg5[%c0_18, %c0_19, %c0_20] : memref<1x1x80xf32, #tpu.memory_space<vmem>>, vector<1x1x80xf32>
      %53 = vector.shape_cast %52 : vector<1x1x80xf32> to vector<1x80xf32>
      %54 = arith.addf %53, %45 : vector<1x80xf32>
      %c0_21 = arith.constant 0 : index
      %c0_22 = arith.constant 0 : index
      %c0_23 = arith.constant 0 : index
      %55 = vector.load %arg5[%c0_21, %c0_22, %c0_23] : memref<1x1x80xf32, #tpu.memory_space<vmem>>, vector<1x1x80xf32>
      %56 = vector.shape_cast %55 : vector<1x1x80xf32> to vector<1x80xf32>
      %57 = vector.shape_cast %54 : vector<1x80xf32> to vector<1x1x80xf32>
      tpu.vector_store %arg5[%c0_21, %c0_22, %c0_23], %57 {strides = array<i32>} : memref<1x1x80xf32, #tpu.memory_space<vmem>>, vector<1x1x80xf32>,
      %c0_24 = arith.constant 0 : index
      %c0_25 = arith.constant 0 : index
      %c0_26 = arith.constant 0 : index
      %58 = vector.load %arg6[%c0_24, %c0_25, %c0_26] : memref<1x1x80xf32, #tpu.memory_space<vmem>>, vector<1x1x80xf32>
      %59 = vector.shape_cast %58 : vector<1x1x80xf32> to vector<1x80xf32>
      %60 = arith.addf %59, %48 : vector<1x80xf32>
      %c0_27 = arith.constant 0 : index
      %c0_28 = arith.constant 0 : index
      %c0_29 = arith.constant 0 : index
      %61 = vector.load %arg6[%c0_27, %c0_28, %c0_29] : memref<1x1x80xf32, #tpu.memory_space<vmem>>, vector<1x1x80xf32>
      %62 = vector.shape_cast %61 : vector<1x1x80xf32> to vector<1x80xf32>
      %63 = vector.shape_cast %60 : vector<1x80xf32> to vector<1x1x80xf32>
      tpu.vector_store %arg6[%c0_27, %c0_28, %c0_29], %63 {strides = array<i32>} : memref<1x1x80xf32, #tpu.memory_space<vmem>>, vector<1x1x80xf32>,
      %c0_30 = arith.constant 0 : index
      %c0_31 = arith.constant 0 : index
      %c0_32 = arith.constant 0 : index
      %64 = vector.load %arg7[%c0_30, %c0_31, %c0_32] : memref<1x1x80xf32, #tpu.memory_space<vmem>>, vector<1x1x80xf32>
      %65 = vector.shape_cast %64 : vector<1x1x80xf32> to vector<1x80xf32>
      %66 = arith.addf %65, %51 : vector<1x80xf32>
      %c0_33 = arith.constant 0 : index
      %c0_34 = arith.constant 0 : index
      %c0_35 = arith.constant 0 : index
      %67 = vector.load %arg7[%c0_33, %c0_34, %c0_35] : memref<1x1x80xf32, #tpu.memory_space<vmem>>, vector<1x1x80xf32>
      %68 = vector.shape_cast %67 : vector<1x1x80xf32> to vector<1x80xf32>
      %69 = vector.shape_cast %66 : vector<1x80xf32> to vector<1x1x80xf32>
      tpu.vector_store %arg7[%c0_33, %c0_34, %c0_35], %69 {strides = array<i32>} : memref<1x1x80xf32, #tpu.memory_space<vmem>>, vector<1x1x80xf32>,
    } else {
    }
    %true = arith.constant true
    %14 = arith.xori %11, %true : i1
    %15 = arith.extui %14 : i1 to i32
    %c0_i32_10 = arith.constant 0 : i32
    %16 = arith.cmpi ne, %15, %c0_i32_10 : i32
    scf.if %16 {
      %17 = tpu.iota {dimensions = array<i32: 0>} : vector<8x1xi32>
      %18 = vector.broadcast %9 : i32 to vector<8x1xi32>
      %19 = arith.addi %17, %18 : vector<8x1xi32>
      %c20_i32_11 = arith.constant 20 : i32
      %20 = vector.broadcast %c20_i32_11 : i32 to vector<8x1xi32>
      %21 = arith.cmpi slt, %19, %20 : vector<8x1xi32>
      %cst = arith.constant 0.000000e+00 : f32
      %22 = vector.shape_cast %21 : vector<8x1xi1> to vector<8x1xi1>
      %23 = vector.broadcast %22 : vector<8x1xi1> to vector<8x80xi1>
      %24 = vector.broadcast %cst : f32 to vector<8x80xf32>
      %25 = arith.select %23, %5, %24 : vector<8x80xi1>, vector<8x80xf32>
      %cst_12 = arith.constant 0.000000e+00 : f32
      %26 = vector.shape_cast %21 : vector<8x1xi1> to vector<8x1xi1>
      %27 = vector.broadcast %26 : vector<8x1xi1> to vector<8x80xi1>
      %28 = vector.broadcast %cst_12 : f32 to vector<8x80xf32>
      %29 = arith.select %27, %6, %28 : vector<8x80xi1>, vector<8x80xf32>
      %30 = vector.broadcast %4 : vector<1x80xf32> to vector<8x80xf32>
      %31 = arith.mulf %29, %30 : vector<8x80xf32>
      %32 = vector.broadcast %3 : vector<1x80xf32> to vector<8x80xf32>
      %33 = arith.addf %32, %31 : vector<8x80xf32>
      %cst_13 = arith.constant 0.000000e+00 : f32
      %34 = vector.shape_cast %21 : vector<8x1xi1> to vector<8x1xi1>
      %35 = vector.broadcast %34 : vector<8x1xi1> to vector<8x80xi1>
      %36 = vector.broadcast %cst_13 : f32 to vector<8x80xf32>
      %37 = arith.select %35, %33, %36 : vector<8x80xi1>, vector<8x80xf32>
      %38 = math.absf %25 : vector<8x80xf32>
      %cst_14 = arith.constant 0.000000e+00 : f32
      %39 = vector.broadcast %cst_14 : f32 to vector<8x80xf32>
      %40 = arith.subf %39, %38 : vector<8x80xf32>
      %41 = math.exp %40 : vector<8x80xf32>
      %cst_15 = arith.constant 1.000000e+00 : f32
      %42 = vector.broadcast %cst_15 : f32 to vector<8x80xf32>
      %43 = arith.addf %42, %41 : vector<8x80xf32>
      %cst_16 = arith.constant 1.000000e+00 : f32
      %44 = vector.broadcast %cst_16 : f32 to vector<8x80xf32>
      %45 = arith.divf %44, %43 : vector<8x80xf32>
      %cst_17 = arith.constant 0.000000e+00 : f32
      %46 = vector.broadcast %cst_17 : f32 to vector<8x80xf32>
      %47 = arith.cmpf oge, %25, %46 : vector<8x80xf32>
      %48 = arith.mulf %41, %45 : vector<8x80xf32>
      %49 = arith.select %47, %45, %48 : vector<8x80xi1>, vector<8x80xf32>
      %50 = arith.subf %29, %49 : vector<8x80xf32>
      %51 = math.absf %50 : vector<8x80xf32>
      %52 = arith.mulf %51, %37 : vector<8x80xf32>
      %cst_18 = arith.constant 0.000000e+00 : f32
      %53 = vector.broadcast %cst_18 : f32 to vector<8x80xf32>
      %54 = arith.maximumf %25, %53 : vector<8x80xf32>
      %55 = arith.mulf %25, %29 : vector<8x80xf32>
      %56 = arith.subf %54, %55 : vector<8x80xf32>
      %57 = math.log1p %41 : vector<8x80xf32>
      %58 = arith.addf %56, %57 : vector<8x80xf32>
      %59 = arith.mulf %51, %52 : vector<8x80xf32>
      %60 = arith.mulf %58, %59 : vector<8x80xf32>
      %cst_19 = arith.constant dense<0.000000e+00> : vector<80xf32>
      %61 = vector.multi_reduction <add>, %60, %cst_19 [0] : vector<8x80xf32> to vector<80xf32>
      %62 = vector.shape_cast %61 : vector<80xf32> to vector<1x80xf32>
      %63 = arith.mulf %52, %29 : vector<8x80xf32>
      %cst_20 = arith.constant dense<0.000000e+00> : vector<80xf32>
      %64 = vector.multi_reduction <add>, %63, %cst_20 [0] : vector<8x80xf32> to vector<80xf32>
      %65 = vector.shape_cast %64 : vector<80xf32> to vector<1x80xf32>
      %cst_21 = arith.constant dense<0.000000e+00> : vector<80xf32>
      %66 = vector.multi_reduction <add>, %52, %cst_21 [0] : vector<8x80xf32> to vector<80xf32>
      %67 = vector.shape_cast %66 : vector<80xf32> to vector<1x80xf32>
      %68 = arith.subf %67, %65 : vector<1x80xf32>
      %c0_22 = arith.constant 0 : index
      %c0_23 = arith.constant 0 : index
      %c0_24 = arith.constant 0 : index
      %69 = vector.load %arg5[%c0_22, %c0_23, %c0_24] : memref<1x1x80xf32, #tpu.memory_space<vmem>>, vector<1x1x80xf32>
      %70 = vector.shape_cast %69 : vector<1x1x80xf32> to vector<1x80xf32>
      %71 = arith.addf %70, %62 : vector<1x80xf32>
      %c0_25 = arith.constant 0 : index
      %c0_26 = arith.constant 0 : index
      %c0_27 = arith.constant 0 : index
      %72 = vector.load %arg5[%c0_25, %c0_26, %c0_27] : memref<1x1x80xf32, #tpu.memory_space<vmem>>, vector<1x1x80xf32>
      %73 = vector.shape_cast %72 : vector<1x1x80xf32> to vector<1x80xf32>
      %74 = vector.shape_cast %71 : vector<1x80xf32> to vector<1x1x80xf32>
      tpu.vector_store %arg5[%c0_25, %c0_26, %c0_27], %74 {strides = array<i32>} : memref<1x1x80xf32, #tpu.memory_space<vmem>>, vector<1x1x80xf32>,
      %c0_28 = arith.constant 0 : index
      %c0_29 = arith.constant 0 : index
      %c0_30 = arith.constant 0 : index
      %75 = vector.load %arg6[%c0_28, %c0_29, %c0_30] : memref<1x1x80xf32, #tpu.memory_space<vmem>>, vector<1x1x80xf32>
      %76 = vector.shape_cast %75 : vector<1x1x80xf32> to vector<1x80xf32>
      %77 = arith.addf %76, %65 : vector<1x80xf32>
      %c0_31 = arith.constant 0 : index
      %c0_32 = arith.constant 0 : index
      %c0_33 = arith.constant 0 : index
      %78 = vector.load %arg6[%c0_31, %c0_32, %c0_33] : memref<1x1x80xf32, #tpu.memory_space<vmem>>, vector<1x1x80xf32>
      %79 = vector.shape_cast %78 : vector<1x1x80xf32> to vector<1x80xf32>
      %80 = vector.shape_cast %77 : vector<1x80xf32> to vector<1x1x80xf32>
      tpu.vector_store %arg6[%c0_31, %c0_32, %c0_33], %80 {strides = array<i32>} : memref<1x1x80xf32, #tpu.memory_space<vmem>>, vector<1x1x80xf32>,
      %c0_34 = arith.constant 0 : index
      %c0_35 = arith.constant 0 : index
      %c0_36 = arith.constant 0 : index
      %81 = vector.load %arg7[%c0_34, %c0_35, %c0_36] : memref<1x1x80xf32, #tpu.memory_space<vmem>>, vector<1x1x80xf32>
      %82 = vector.shape_cast %81 : vector<1x1x80xf32> to vector<1x80xf32>
      %83 = arith.addf %82, %68 : vector<1x80xf32>
      %c0_37 = arith.constant 0 : index
      %c0_38 = arith.constant 0 : index
      %c0_39 = arith.constant 0 : index
      %84 = vector.load %arg7[%c0_37, %c0_38, %c0_39] : memref<1x1x80xf32, #tpu.memory_space<vmem>>, vector<1x1x80xf32>
      %85 = vector.shape_cast %84 : vector<1x1x80xf32> to vector<1x80xf32>
      %86 = vector.shape_cast %83 : vector<1x80xf32> to vector<1x1x80xf32>
      tpu.vector_store %arg7[%c0_37, %c0_38, %c0_39], %86 {strides = array<i32>} : memref<1x1x80xf32, #tpu.memory_space<vmem>>, vector<1x1x80xf32>,
    } else {
    }
    return
  }
  func.func @transform_0(%arg0: i32, %arg1: i32) -> (i32, i32) {
    %c2_i32 = arith.constant 2 : i32
    %0 = arith.muli %arg0, %c2_i32 : i32
    %1 = arith.addi %0, %arg1 : i32
    %c2_i32_0 = arith.constant 2 : i32
    %2 = arith.minsi %1, %c2_i32_0 : i32
    %c0_i32 = arith.constant 0 : i32
    %c0_i32_1 = arith.constant 0 : i32
    return %2, %c0_i32 : i32, i32
  }
  func.func @transform_1(%arg0: i32, %arg1: i32) -> (i32, i32) {
    %c2_i32 = arith.constant 2 : i32
    %0 = arith.muli %arg0, %c2_i32 : i32
    %1 = arith.addi %0, %arg1 : i32
    %c2_i32_0 = arith.constant 2 : i32
    %2 = arith.minsi %1, %c2_i32_0 : i32
    %c0_i32 = arith.constant 0 : i32
    %c0_i32_1 = arith.constant 0 : i32
    return %2, %c0_i32 : i32, i32
  }
  func.func @transform_2(%arg0: i32, %arg1: i32) -> (i32, i32) {
    %c0_i32 = arith.constant 0 : i32
    %c0_i32_0 = arith.constant 0 : i32
    %c0_i32_1 = arith.constant 0 : i32
    return %c0_i32, %c0_i32_0 : i32, i32
  }
  func.func @transform_3(%arg0: i32, %arg1: i32) -> (i32, i32, i32) {
    %c0_i32 = arith.constant 0 : i32
    %c0_i32_0 = arith.constant 0 : i32
    %c0_i32_1 = arith.constant 0 : i32
    return %arg0, %c0_i32, %c0_i32_0 : i32, i32, i32
  }
  func.func @transform_4(%arg0: i32, %arg1: i32) -> (i32, i32, i32) {
    %c0_i32 = arith.constant 0 : i32
    %c0_i32_0 = arith.constant 0 : i32
    %c0_i32_1 = arith.constant 0 : i32
    return %arg0, %c0_i32, %c0_i32_0 : i32, i32, i32
  }
  func.func @transform_5(%arg0: i32, %arg1: i32) -> (i32, i32, i32) {
    %c0_i32 = arith.constant 0 : i32
    %c0_i32_0 = arith.constant 0 : i32
    %c0_i32_1 = arith.constant 0 : i32
    return %arg0, %c0_i32, %c0_i32_0 : i32, i32, i32
  }
}

</mosaic_0001>

<bundles_post_ra>
// kernel: tpu_custom_call.1
= control target key start
LH: loop header
LB: loop body
LE: loop exit
PB: predicated region body
PF: predicated region fallthrough
CT: control target
= control target key end

     0   :  { %s1605_s0 = inlined_call_operand.hbm [shape: f32[20,80], index: 0, kind: input, shape index: {}]   ;;  %s1606_s1 = inlined_call_operand.hbm [shape: f32[20,80], index: 1, kind: input, shape index: {}]   ;;  %s1607_s2 = inlined_call_operand.vmem [shape: f32[1,80], index: 2, kind: input, shape index: {}]   ;;  %s1608_s3 = inlined_call_operand.hbm [shape: f32[2,1,80], index: 3, kind: output, shape index: {0}]   ;;  %s1609_s4 = inlined_call_operand.hbm [shape: f32[2,1,80], index: 4, kind: output, shape index: {1}]   ;;  %s1610_s5 = inlined_call_operand.hbm [shape: f32[2,1,80], index: 5, kind: output, shape index: {2}]  }
   0x1   :  { %1621 = sst [smem:[#allocation23_spill]] %s1605_s0 }
   0x2   :  { %11 = vsyncpa [#allocation5], 0 }
   0x3   :  { %13 = vsyncpa [#allocation5 + $0x1], 0 }
   0x4   :  { %14 = vsyncpa [#allocation8], 0 }
   0x5   :  { %16 = vsyncpa [#allocation8 + $0x1], 0 }
   0x6   :  { %17 = vsyncpa [#allocation6], 0 }
   0x7   :  { %19 = vsyncpa [#allocation6 + $0x1], 0 }
   0x8   :  { %20 = vsyncpa [#allocation11], 0 }
   0x9   :  { %22 = vsyncpa [#allocation11 + $0x1], 0  ;;  %s1180_s18 = smov 0   ;;  %s1182_s19 = smov 0  }
   0xa   :  { %s1184_s20 = smov 0   ;;  %s1186_s21 = smov 0  }
   0xb   :  { %s1188_s22 = smov 0   ;;  %s1190_s23 = smov 0  }
   0xc   :  { %s1192_s24 = smov 0   ;;  %s1194_s25 = smov 0  }
   0xd   :  { %s1196_s26 = smov 0   ;;  %s1198_s27 = smov 0  }
   0xe   :  { %s1200_s28 = smov 0  }
   0xf LB: > { %1622 = sst [smem:[#allocation17_spill]] %s1122_s23  ;;  %s1236_s29 = sadd.s32 4294967295, %s1142_s28   ;;  %s1142_s28 = sphi %s1200_s28, %s28_s28   ;;  %s1138_s27 = sphi %s1198_s27, %s1649_s27   ;;  %s1134_s26 = sphi %s1196_s26, %s1648_s26   ;;  %s1130_s25 = sphi %s1194_s25, %s1647_s25   ;;  %s1126_s24 = sphi %s1192_s24, %s1646_s24   ;;  %s1122_s23 = sphi %s1190_s23, %s1645_s23   ;;  %s1118_s22 = sphi %s1188_s22, %s1654_s22   ;;  %s1114_s21 = sphi %s1186_s21, %s1653_s21   ;;  %s1110_s20 = sphi %s1184_s20, %s1652_s20   ;;  %s1106_s19 = sphi %s1182_s19, %s1651_s19   ;;  %s1102_s18 = sphi %s1180_s18, %s1650_s18  }
  0x10   : > { %1623 = sst [smem:[#allocation18_spill]] %s1134_s26  ;;  %s1611_s30 = sadd.s32 4294967294, %s1142_s28  }
  0x11   : > { %1624 = sst [smem:[#allocation19_spill]] %s1138_s27  ;;  %s37_s6 = sadd.s32 1, %s1134_s26 }
  0x12   : > { %s40_s7 = sadd.s32 1, %s1138_s27  ;;  %p38_p0 = scmp.ge.s32.totalorder %s37_s6, 2 }
  0x13   : > { %s736_s8 = sshll.u32 %s1138_s27, 1  ;;  %s55_s10 = sadd.s32 1, %s1122_s23 }
  0x14   : > { %s45_s9 = sadd.s32 %s1134_s26, %s736_s8  ;;  %s1656_s6 = smov (%p38_p0, %s37_s6), 0 }
  0x15   : > { %1625 = sst [smem:[#allocation20_spill]] %s1656_s6  ;;  %s1658_s7 = smov (!%p38_p0, %s40_s7), %s1138_s27 }
  0x16   : > { %p46_p1 = scmp.lt.s32.totalorder %s45_s9, 2  ;;  %p62_p2 = scmp.ne.s32.totalorder %s1122_s23, %s1118_s22 }
  0x17   : > { %p42_p3 = scmp.ge.s32.totalorder %s1658_s7, 2  ;;  %p63_p4 = scmp.eq.s32.totalorder %s1142_s28, 0 }
  0x18   : > { %s1660_s9 = smov (!%p46_p1, %s45_s9), 2  ;;  %p68_p6 = scmp.ne.s32.totalorder %s1118_s22, %s1114_s21 }
  0x19   : > { %s1662_s7 = smov (%p42_p3, %s1658_s7), 0  ;;  %p1254_p5 = por %p63_p4, %p62_p2 }
  0x1a   : > { %1626 = sst [smem:[#allocation21_spill]] %s1662_s7  ;;  %s737_s12 = sshll.u32 %s1662_s7, 1 }
  0x1b   : > { %p69_p7 = scmp.eq.s32.totalorder %s1236_s29, 0  ;;  %s49_s13 = sadd.s32 %s737_s12, %s1656_s6 }
  0x1c   : > { %s133_s14 = ssub.s32 %s1138_s27, %s1662_s7  ;;  %p50_p8 = scmp.lt.s32.totalorder %s49_s13, 2 }
  0x1d   : > { %p1265_p9 = por %p69_p7, %p68_p6  ;;  %p134_p10 = scmp.eq.s32.totalorder %s133_s14, 0 }
  0x1e   : > { %s136_s16 = sadd.s32 1, %s1110_s20  ;;  %s1664_s13 = smov (!%p50_p8, %s49_s13), 2 }
  0x1f   : > { %s1628_s15 = scalar_select %p1265_p9, 1, 0 }
  0x20   : > { %s1271_s17 = scalar_select %p134_p10, %s1110_s20, %s136_s16  }
  0x21   : > { %s52_s21 = ssub.s32 %s1660_s9, %s1664_s13  ;;  %p146_p11 = scmp.ne.s32.totalorder %s1110_s20, %s1106_s19 }
  0x22   : > { %p53_p12 = scmp.eq.s32.totalorder %s52_s21, 0  ;;  %p147_p13 = scmp.eq.s32.totalorder %s1236_s29, 3 }
  0x23   : > { %p152_p0 = scmp.ne.s32.totalorder %s1106_s19, %s1102_s18  ;;  %p153_p1 = scmp.eq.s32.totalorder %s1611_s30, 3 }
  0x24   : > { %s1282_s8 = scalar_select %p53_p12, %s1122_s23, %s55_s10  }
  0x25   : > { %p1284_p2 = por %p147_p13, %p146_p11  ;;  %p1288_p3 = por %p153_p1, %p152_p0 }
  0x26   : > { %1629 = sst [smem:[#allocation22_spill]] %s1282_s8  ;;  %p789_p4 = scmp.lt.s32.totalorder %s1142_s28, 4 }
  0x27   : > { %s1630_s12 = scalar_select %p1284_p2, 1, 0 }
  0x28   : > { %s1631_s14 = scalar_select %p1288_p3, 1, 0 }
  0x29   : > { %s1294_s13 = sand.u32 1, %s1122_s23   ;;  %s1617_s16 = sshll.u32 %s1660_s9, 7 }
  0x2a   : > { %s1616_s21 = sshll.u32 %s1294_s13, 3  ;;  %s1632_s0 = sld [smem:[#allocation23_spill]] }
  0x2b   : > { %s232_s6 = scalar_lea.vmem [#allocation4], %s1616_s21  ;;  %p1309_p6 = pnand %p789_p4, %p1254_p5 }
  0x2c   : > { %s243_s27 = sshll.u32 %s232_s6, 4  ;;  %s229_s30 = scalar_lea.sflag [#allocation5], %s1294_s13  ;;  %s1313_s27 = int_to_ptr.vmem [resolvable:$true] %s243_s27 }
  0x2d   : > { %p898_p11 = pneg %p1309_p6 }
  0x30   : > { %s1303_s7 = scalar_lea.hbm %s1632_s0, %s1617_s16  ;;  %s901_s21 = scalar_lea.hbm %s1632_s0, 384 }
  0x31   : > { %s896_s10 = scalar_lea.hbm %s1303_s7, 128  ;;  %p902_p5 = scmp.lt.u32.totalorder %s1303_s7, %s1632_s0 }
  0x32   : > { %p897_p10 = scmp.ne.s32.totalorder %s1303_s7, %s896_s10  ;;  %p903_p0 = scmp.lt.u32.totalorder %s901_s21, %s896_s10 }
  0x33   : > { %p905_p4 = scmp.lt.u32.totalorder %s896_s10, %s1303_s7 }
  0x34   : > { %p899_p12 = pnand %p898_p11, %p897_p10  ;;  %p904_p1 = por %p903_p0, %p902_p5 }
  0x36   : > { %p900_p13 = pneg %p899_p12  ;;  %p906_p7 = por %p905_p4, %p904_p1 }
  0x38   : > { %p907_p8 = pnand %p906_p7, %p900_p13 }
  0x3a   : > { %910 = shalt.err (!%p907_p8)
}
  0x3b   : > { %s911_s23 = scalar_lea.vmem %s1313_s27, 128  ;;  %s1144_s6 = smov [#allocation4]  }
  0x3c   : > { %p912_p10 = scmp.ne.s32.totalorder %s1313_s27, %s911_s23  ;;  %s916_s11 = sshll.u32 %s1144_s6, 4  ;;  %s917_s11 = int_to_ptr.vmem [resolvable:$false] %s916_s11 }
  0x3d   : > { %s918_s8 = scalar_lea.vmem %s917_s11, 256  ;;  %p919_p2 = scmp.lt.s32.totalorder %s1313_s27, %s917_s11 }
  0x3e   : > { %p914_p12 = pnand %p912_p10, %p898_p11  ;;  %p920_p5 = scmp.lt.s32.totalorder %s918_s8, %s911_s23 }
  0x40   : > { %p915_p3 = pneg %p914_p12  ;;  %p921_p0 = por %p920_p5, %p919_p2 }
  0x42   : > { %p922_p1 = pnand %p921_p0, %p915_p3 }
  0x44   : > { %925 = shalt.err (!%p922_p1)
}
  0x45   : > { %775 = dma.hbm_to_vmem [thread:$0]  (!%p1309_p6), %s1303_s7, 128, %s1313_s27, %s229_s30  }
  0x46   : > { %p1634_p7 = scmp.lt.s32.totalorder %s1142_s28, 5  ;;  %p1635_p8 = scmp.ge.s32.totalorder %s1142_s28, 1 }
  0x47   : > { %s1637_s23 = sshll.u32 %s1660_s9, 7  ;;  %s1638_s11 = sshll.u32 %s1294_s13, 3 }
  0x48   : > { %p1347_p13 = pnand %p1635_p8, %p1634_p7  ;;  %s1356_s6 = scalar_lea.hbm %s1606_s1, %s1637_s23 }
  0x49   : > { %s254_s8 = scalar_lea.vmem [#allocation7], %s1638_s11  ;;  %s251_s27 = scalar_lea.sflag [#allocation8], %s1294_s13 }
  0x4a   : > { %s1636_s16 = scalar_select %p1347_p13, 1, 0 }
  0x4b   : > { %s265_s0 = sshll.u32 %s254_s8, 4  ;;  %s926_s7 = scalar_lea.hbm %s1356_s6, 128  ;;  %s266_s0 = int_to_ptr.vmem [resolvable:$true] %s265_s0 }
  0x4c   : > { %p927_p2 = scmp.ne.s32.totalorder %s1356_s6, %s926_s7  ;;  %s931_s23 = scalar_lea.hbm %s1606_s1, 384 }
  0x4d   : > { %p932_p10 = scmp.lt.u32.totalorder %s1356_s6, %s1606_s1  ;;  %p933_p12 = scmp.lt.u32.totalorder %s931_s23, %s926_s7 }
  0x4e   : > { %p929_p3 = pnand %p927_p2, %p898_p11  ;;  %p935_p0 = scmp.lt.u32.totalorder %s926_s7, %s1356_s6 }
  0x4f   : > { %p934_p5 = por %p933_p12, %p932_p10 }
  0x50   : > { %p930_p4 = pneg %p929_p3 }
  0x51   : > { %p936_p1 = por %p935_p0, %p934_p5 }
  0x53   : > { %p937_p7 = pnand %p936_p1, %p930_p4 }
  0x55   : > { %940 = shalt.err (!%p937_p7)
}
  0x56   : > { %s941_s13 = scalar_lea.vmem %s266_s0, 128  ;;  %s1145_s11 = smov [#allocation7]  }
  0x57   : > { %p942_p8 = scmp.ne.s32.totalorder %s266_s0, %s941_s13  ;;  %s946_s8 = sshll.u32 %s1145_s11, 4  ;;  %s947_s8 = int_to_ptr.vmem [resolvable:$false] %s946_s8 }
  0x58   : > { %s948_s9 = scalar_lea.vmem %s947_s8, 256  ;;  %p949_p9 = scmp.lt.s32.totalorder %s266_s0, %s947_s8 }
  0x59   : > { %p944_p2 = pnand %p942_p8, %p898_p11  ;;  %p950_p13 = scmp.lt.s32.totalorder %s948_s9, %s941_s13 }
  0x5b   : > { %p945_p3 = pneg %p944_p2  ;;  %p951_p10 = por %p950_p13, %p949_p9 }
  0x5d   : > { %p952_p12 = pnand %p951_p10, %p945_p3 }
  0x5f   : > { %955 = shalt.err (!%p952_p12)
}
  0x60   : > { %778 = dma.hbm_to_vmem [thread:$0]  (!%p1309_p6), %s1356_s6, 128, %s266_s0, %s251_s27  }
  0x61   : > { %p1639_p4 = scmp.ne.s32.totalorder %s1636_s16, 0 }
  0x62   : > { %s276_s7 = sand.u32 (!%p1639_p4), 1, %s1118_s22   ;;  %p1640_p11 = scmp.ne.s32.totalorder (!%p1639_p4), %s1628_s15, 0 }
  0x63   : > { %274 = sbr.rel (%p1639_p4) target bundleno = 350 (0x15e), region = 32  ;;  %s749_s30 = sshll.u32 (!%p1639_p4), %s276_s7, 3 }
  0x64   : > { %s277_s23 = scalar_lea.sflag (!%p1639_p4), [#allocation5], %s276_s7  ;;  %s1383_s21 = scalar_lea.vmem (!%p1639_p4), [#allocation4], %s749_s30 }
  0x6a   : > { %1085 = dma.done.wait (%p1640_p11), %s277_s23, 128  }
  0x6b   : > { %1087 = vsyncadd (%p1640_p11), %s277_s23, 4294967168  ;;  %s286_s10 = scalar_lea.sflag [#allocation8], %s276_s7  ;;  %s1389_s26 = scalar_lea.vmem [#allocation7], %s749_s30 }
  0x6c   : > { %1089 = dma.done.wait (%p1640_p11), %s286_s10, 128  }
  0x6d   : > { %1091 = vsyncadd (%p1640_p11), %s286_s10, 4294967168  ;;  %s1396_s0 = sand.u32 1, %s1106_s19   ;;  %p751_p9 = scmp.ne.s32.totalorder %s1126_s24, 0 }
  0x6e   : > { %s1399_s16 = scalar_lea.vmem [#allocation9], %s1396_s0  ;;  %s1402_s6 = scalar_lea.vmem [#allocation10], %s1396_s0  ;;  %v340_v0 = vld [vmem:[%s1607_s2] sm:$0x1] (!%p751_p9)  ;;  %vm348_vm0 = vcmask (!%p751_p9), 647168   ;;  %v1146_v2 = vmov (!%p751_p9), 0.0  }
  0x6f   : > { %s1405_s27 = scalar_lea.vmem [#allocation12], %s1396_s0  ;;  %339 = sbr.rel (%p751_p9) target bundleno = 146 (0x92), region = 44  ;;  %v752_v1 = vadd.f32 (!%p751_p9), -0.8, %v340_v0  ;;  %353 = vst.msk [vmem:[%s1399_s16] sm:$0x1] (!%p751_p9), %vm348_vm0, %v1146_v2 }
  0x70   : > { %354 = vst.msk [vmem:[%s1402_s6] sm:$0x1] (!%p751_p9), %vm348_vm0, %v1146_v2  ;;  %355 = vst.msk [vmem:[%s1405_s27] sm:$0x1] (!%p751_p9), %vm348_vm0, %v1146_v2 }
  0x71   : > { %v342_v3 = vmul.f32 (!%p751_p9), -12.0, %v752_v1 }
  0x73   : > { %v343_v4 = vmul.f32 (!%p751_p9), 1.442695, %v342_v3 }
  0x75   : > { %880 = vpow2.f32 (!%p751_p9), %v343_v4 }
  0x7f   : > { %v881_v5 = vpop.eup %880 }
  0x80   : > { %v345_v6 = vadd.f32 1.0, %v881_v5 }
  0x82   : > { %882 = vrcp.f32 %v345_v6 }
  0x8c   : > { %v883_v7 = vpop.eup %882 }
  0x8d   : > { %349 = vst.msk [vmem:[#allocation2] sm:$0x1] %vm348_vm0, %v883_v7  ;;  %v350_v8 = vsub.f32 1.0, %v883_v7 }
  0x8f   : > { %v351_v9 = vmul.f32 5.0, %v350_v8 }
  0x91   : > { %352 = vst.msk [vmem:[#allocation3] sm:$0x1] %vm348_vm0, %v351_v9 }
  0x92 PF: > { %v1424_v12 = vld [vmem:[%s1383_s21] sm:$0xff]  ;;  %s753_s15 = sshll.u32 %s1130_s25, 1  ;;  %v1428_v13 = vld [vmem:[%s1389_s26] sm:$0xff] }
  0x93   : > { %s1431_s8 = sadd.s32 %s1126_s24, %s753_s15 }
  0x94   : > { %v1419_v10 = vld [vmem:[#allocation2] sm:$0x1]  ;;  %s754_s9 = sshll.u32 %s1431_s8, 3 }
  0x95   : > { %s1436_s7 = sadd.s32 8, %s754_s9 }
  0x96   : > { %p755_p6 = scmp.gt.s32.totalorder %s1436_s7, 20 }
  0x97   : > { %v382_v14 = vand.u32 (!%p755_p6), 2147483647, %v1424_v12  ;;  %v369_v17 = vlaneseq (!%p755_p6)  ;;  %vm389_vm1 = vcmp.ge.f32.partialorder (!%p755_p6), %v1424_v12, 0.0  ;;  %v395_v29 = vmax.f32 (!%p755_p6), %v1424_v12, 0.0  ;;  %v438_v0 = vld [vmem:[%s1402_s6] sm:$0x1] (!%p755_p6) }
  0x98   : > { %v1421_v11 = vld [vmem:[#allocation3] sm:$0x1]  ;;  %367 = sbr.rel (%p755_p6) target bundleno = 210 (0xd2), region = 48  ;;  %v396_v30 = vmul.f32 (!%p755_p6), %v1428_v13, %v1424_v12  ;;  %vm410_vm3 = vcmask (!%p755_p6), 654336   ;;  %v434_v3 = vld [vmem:[%s1399_s16] sm:$0x1] (!%p755_p6) }
  0x99   : > { %v383_v15 = vsub.f32 (!%p755_p6), 0.0, %v382_v14  ;;  %v370_v19 = vshrl.u32 (!%p755_p6), %v369_v17, 7  ;;  %vm436_vm4 = vcmask (!%p755_p6), 647168   ;;  %v441_v4 = vld [vmem:[%s1405_s27] sm:$0x1] (!%p755_p6) }
  0x9a   : > { %v397_v38 = vsub.f32 (!%p755_p6), %v395_v29, %v396_v30 }
  0x9b   : > { %v384_v16 = vmul.f32 (!%p755_p6), 1.442695, %v383_v15  ;;  %v371_v21 = vsub.s32 (!%p755_p6), 0, %v370_v19 }
  0x9d   : > { %884 = vpow2.f32 (!%p755_p6), %v384_v16  ;;  %v372_v23 = vrot.slane (!%p755_p6), %v1421_v11, %v371_v21  ;;  %v379_v28 = vrot.slane (!%p755_p6), %v1419_v10, %v371_v21 }
  0x9f   : > { %v374_v27 = vmul.f32 %v372_v23, %v1428_v13 }
  0xa1   : > { %v381_v36 = vadd.f32 %v379_v28, %v374_v27 }
  0xa7   : > { %v885_v18 = vpop.eup %884 }
  0xa8   : > { %v386_v20 = vadd.f32 1.0, %v885_v18  ;;  %v401_v22 = vmul.f32 -0.5, %v885_v18  ;;  %v404_v25 = vand.u32 2147483647, %v885_v18 }
  0xaa   : > { %886 = vrcp.f32 %v386_v20  ;;  %v402_v24 = vadd.f32 1.0, %v401_v22  ;;  %vm405_vm2 = vcmp.lt.f32.partialorder %v404_v25, 0.0004427343 }
  0xab   : > { %888 = vlog2.f32 %v386_v20 }
  0xac   : > { %v403_v33 = vmul.f32 %v885_v18, %v402_v24 }
  0xb4   : > { %v887_v26 = vpop.eup %886 }
  0xb5   : > { %v889_v31 = vpop.eup %888  ;;  %v390_v32 = vmul.f32 %v887_v26, %v885_v18 }
  0xb6   : > { %v400_v34 = vmul.f32 0.6931472, %v889_v31 }
  0xb7   : > { %v391_v35 = vsel %vm389_vm1, %v887_v26, %v390_v32 }
  0xb8   : > { %v392_v37 = vsub.f32 %v1428_v13, %v391_v35  ;;  %v406_v39 = vsel %vm405_vm2, %v403_v33, %v400_v34 }
  0xb9   : > { %v407_v42 = vadd.f32 %v406_v39, %v397_v38 }
  0xba   : > { %v393_v40 = vand.u32 2147483647, %v392_v37 }
  0xbc   : > { %v394_v41 = vmul.f32 %v393_v40, %v381_v36 }
  0xbe   : > { %v408_v43 = vmul.f32 %v394_v41, %v393_v40  ;;  %v418_v44 = vmul.f32 %v394_v41, %v1428_v13  ;;  %v426_v45 = vsel %vm410_vm3, %v394_v41, 0.0 }
  0xbf   : > { %v427_v46 = vrot.slane %v426_v45, 4 }
  0xc0   : > { %v409_v47 = vmul.f32 %v408_v43, %v407_v42  ;;  %v419_v48 = vsel %vm410_vm3, %v418_v44, 0.0 }
  0xc1   : > { %v420_v49 = vrot.slane %v419_v48, 4  ;;  %v428_v50 = vadd.f32 %v427_v46, %v426_v45 }
  0xc2   : > { %v411_v51 = vsel %vm410_vm3, %v409_v47, 0.0 }
  0xc3   : > { %v412_v52 = vrot.slane %v411_v51, 4  ;;  %v421_v53 = vadd.f32 %v420_v49, %v419_v48  ;;  %v429_v54 = vrot.slane %v428_v50, 2 }
  0xc5   : > { %v413_v55 = vadd.f32 %v412_v52, %v411_v51  ;;  %v422_v56 = vrot.slane %v421_v53, 2  ;;  %v430_v57 = vadd.f32 %v429_v54, %v428_v50 }
  0xc7   : > { %v414_v58 = vrot.slane %v413_v55, 2  ;;  %v423_v59 = vadd.f32 %v422_v56, %v421_v53  ;;  %v431_v60 = vrot.slane %v430_v57, 1 }
  0xc9   : > { %v415_v61 = vadd.f32 %v414_v58, %v413_v55  ;;  %v424_v62 = vrot.slane %v423_v59, 1  ;;  %v432_v63 = vadd.f32 %v431_v60, %v430_v57 }
  0xcb   : > { %v416_v1 = vrot.slane %v415_v61, 1  ;;  %v425_v2 = vadd.f32 %v424_v62, %v423_v59 }
  0xcd   : > { %v417_v5 = vadd.f32 %v416_v1, %v415_v61  ;;  %v439_v6 = vadd.f32 %v438_v0, %v425_v2  ;;  %v433_v7 = vsub.f32 %v432_v63, %v425_v2 }
  0xcf   : > { %v435_v8 = vadd.f32 %v434_v3, %v417_v5  ;;  %440 = vst.msk [vmem:[%s1402_s6] sm:$0x1] %vm436_vm4, %v439_v6  ;;  %v442_v9 = vadd.f32 %v441_v4, %v433_v7 }
  0xd1   : > { %437 = vst.msk [vmem:[%s1399_s16] sm:$0x1] %vm436_vm4, %v435_v8  ;;  %443 = vst.msk [vmem:[%s1405_s27] sm:$0x1] %vm436_vm4, %v442_v9 }
  0xd2 PF: > { %p756_p13 = scmp.le.s32.totalorder %s1436_s7, 20 }
  0xd3   : > { %v448_v14 = vlaneseq (!%p756_p13)  ;;  %v450_v15 = vstv (!%p756_p13), %s754_s9  ;;  %vm500_vm8 = vcmask (!%p756_p13), 654336   ;;  %vm526_vm9 = vcmask (!%p756_p13), 647168  }
  0xd4   : > { %447 = sbr.rel (%p756_p13) target bundleno = 278 (0x116), region = 52 }
  0xd5   : > { %v449_v16 = vshrl.u32 (!%p756_p13), %v448_v14, 7 }
  0xd6   : > { %v528_v1 = vld [vmem:[%s1402_s6] sm:$0x1] (!%p756_p13) }
  0xd7   : > { %v451_v17 = vadd.s32 (!%p756_p13), %v450_v15, %v449_v16  ;;  %v460_v24 = vsub.s32 (!%p756_p13), 0, %v449_v16 }
  0xd8   : > { %v524_v4 = vld [vmem:[%s1399_s16] sm:$0x1] (!%p756_p13) }
  0xd9   : > { %vm452_vm5 = vcmp.lt.s32.totalorder (!%p756_p13), %v451_v17, 20  ;;  %v461_v25 = vrot.slane (!%p756_p13), %v1421_v11, %v460_v24  ;;  %v468_v29 = vrot.slane (!%p756_p13), %v1419_v10, %v460_v24  ;;  %v531_v5 = vld [vmem:[%s1405_s27] sm:$0x1] (!%p756_p13) }
  0xda   : > { %v455_v18 = vsel (!%p756_p13), %vm452_vm5, %v1424_v12, 0.0  ;;  %v456_v27 = vsel (!%p756_p13), %vm452_vm5, %v1428_v13, 0.0 }
  0xdb   : > { %v472_v19 = vand.u32 2147483647, %v455_v18  ;;  %v463_v28 = vmul.f32 %v461_v25, %v456_v27  ;;  %vm479_vm6 = vcmp.ge.f32.partialorder %v455_v18, 0.0  ;;  %v485_v32 = vmax.f32 %v455_v18, 0.0 }
  0xdc   : > { %v486_v33 = vmul.f32 %v456_v27, %v455_v18 }
  0xdd   : > { %v473_v20 = vsub.f32 0.0, %v472_v19  ;;  %v470_v35 = vadd.f32 %v468_v29, %v463_v28 }
  0xde   : > { %v487_v40 = vsub.f32 %v485_v32, %v486_v33 }
  0xdf   : > { %v474_v21 = vmul.f32 1.442695, %v473_v20  ;;  %v471_v13 = vsel %vm452_vm5, %v470_v35, 0.0 }
  0xe1   : > { %890 = vpow2.f32 %v474_v21 }
  0xeb   : > { %v891_v22 = vpop.eup %890 }
  0xec   : > { %v476_v23 = vadd.f32 1.0, %v891_v22  ;;  %v491_v26 = vmul.f32 -0.5, %v891_v22  ;;  %v494_v12 = vand.u32 2147483647, %v891_v22 }
  0xee   : > { %892 = vrcp.f32 %v476_v23  ;;  %v492_v30 = vadd.f32 1.0, %v491_v26  ;;  %vm495_vm7 = vcmp.lt.f32.partialorder %v494_v12, 0.0004427343 }
  0xef   : > { %894 = vlog2.f32 %v476_v23 }
  0xf0   : > { %v493_v37 = vmul.f32 %v891_v22, %v492_v30 }
  0xf8   : > { %v893_v31 = vpop.eup %892 }
  0xf9   : > { %v895_v34 = vpop.eup %894  ;;  %v480_v36 = vmul.f32 %v893_v31, %v891_v22 }
  0xfa   : > { %v490_v38 = vmul.f32 0.6931472, %v895_v34 }
  0xfb   : > { %v481_v11 = vsel %vm479_vm6, %v893_v31, %v480_v36 }
  0xfc   : > { %v482_v39 = vsub.f32 %v456_v27, %v481_v11  ;;  %v496_v41 = vsel %vm495_vm7, %v493_v37, %v490_v38 }
  0xfd   : > { %v497_v43 = vadd.f32 %v496_v41, %v487_v40 }
  0xfe   : > { %v483_v42 = vand.u32 2147483647, %v482_v39 }
 0x100   : > { %v484_v10 = vmul.f32 %v483_v42, %v471_v13 }
 0x102   : > { %v498_v44 = vmul.f32 %v484_v10, %v483_v42  ;;  %v508_v45 = vmul.f32 %v484_v10, %v456_v27  ;;  %v516_v46 = vsel %vm500_vm8, %v484_v10, 0.0 }
 0x103   : > { %v517_v47 = vrot.slane %v516_v46, 4 }
 0x104   : > { %v499_v48 = vmul.f32 %v498_v44, %v497_v43  ;;  %v509_v49 = vsel %vm500_vm8, %v508_v45, 0.0 }
 0x105   : > { %v510_v50 = vrot.slane %v509_v49, 4  ;;  %v518_v51 = vadd.f32 %v517_v47, %v516_v46 }
 0x106   : > { %v501_v52 = vsel %vm500_vm8, %v499_v48, 0.0 }
 0x107   : > { %v502_v53 = vrot.slane %v501_v52, 4  ;;  %v511_v54 = vadd.f32 %v510_v50, %v509_v49  ;;  %v519_v55 = vrot.slane %v518_v51, 2 }
 0x109   : > { %v503_v56 = vadd.f32 %v502_v53, %v501_v52  ;;  %v512_v57 = vrot.slane %v511_v54, 2  ;;  %v520_v58 = vadd.f32 %v519_v55, %v518_v51 }
 0x10b   : > { %v504_v59 = vrot.slane %v503_v56, 2  ;;  %v513_v60 = vadd.f32 %v512_v57, %v511_v54  ;;  %v521_v61 = vrot.slane %v520_v58, 1 }
 0x10d   : > { %v505_v62 = vadd.f32 %v504_v59, %v503_v56  ;;  %v514_v63 = vrot.slane %v513_v60, 1  ;;  %v522_v0 = vadd.f32 %v521_v61, %v520_v58 }
 0x10f   : > { %v506_v2 = vrot.slane %v505_v62, 1  ;;  %v515_v3 = vadd.f32 %v514_v63, %v513_v60 }
 0x111   : > { %v507_v6 = vadd.f32 %v506_v2, %v505_v62  ;;  %v529_v7 = vadd.f32 %v528_v1, %v515_v3  ;;  %v523_v8 = vsub.f32 %v522_v0, %v515_v3 }
 0x113   : > { %v525_v9 = vadd.f32 %v524_v4, %v507_v6  ;;  %530 = vst.msk [vmem:[%s1402_s6] sm:$0x1] %vm526_vm9, %v529_v7  ;;  %v532_v14 = vadd.f32 %v531_v5, %v523_v8 }
 0x115   : > { %527 = vst.msk [vmem:[%s1399_s16] sm:$0x1] %vm526_vm9, %v525_v9  ;;  %533 = vst.msk [vmem:[%s1405_s27] sm:$0x1] %vm526_vm9, %v532_v14 }
 0x116 PF: > { %s538_s24 = sand.u32 1, %s1236_s29   ;;  %s1473_s30 = sshll.u32 %s1130_s25, 4 }
 0x117   : > { %s1479_s10 = scalar_lea.hbm %s1609_s4, %s1473_s30  ;;  %s568_s26 = sshll.u32 %s1402_s6, 4  ;;  %s1482_s26 = int_to_ptr.vmem [resolvable:$true] %s568_s26 }
 0x118   : > { %s1488_s15 = scalar_lea.hbm %s1608_s3, %s1473_s30  ;;  %s1490_s25 = scalar_lea.sflag [#allocation11], %s538_s24 }
 0x119   : > { %s956_s29 = scalar_lea.vmem %s1482_s26, 16  ;;  %p1641_p0 = scmp.ne.s32.totalorder %s1630_s12, 0 }
 0x11a   : > { %p957_p5 = scmp.ne.s32.totalorder %s1482_s26, %s956_s29  ;;  %s1147_s8 = smov [#allocation10]  }
 0x11b   : > { %s960_s9 = sshll.u32 %s1147_s8, 4  ;;  %s961_s9 = int_to_ptr.vmem [resolvable:$false] %s960_s9 }
 0x11c   : > { %p958_p1 = pnand %p957_p5, %p1641_p0  ;;  %s962_s6 = scalar_lea.vmem %s961_s9, 32 }
 0x11d   : > { %p963_p8 = scmp.lt.s32.totalorder %s1482_s26, %s961_s9  ;;  %p964_p2 = scmp.lt.s32.totalorder %s962_s6, %s956_s29 }
 0x11e   : > { %p959_p7 = pneg %p958_p1 }
 0x11f   : > { %p965_p3 = por %p964_p2, %p963_p8 }
 0x121   : > { %p966_p10 = pnand %p965_p3, %p959_p7 }
 0x123   : > { %969 = shalt.err (!%p966_p10)
}
 0x124   : > { %s970_s7 = scalar_lea.hbm %s1479_s10, 16  ;;  %s974_s21 = scalar_lea.hbm %s1609_s4, 32 }
 0x125   : > { %p971_p12 = scmp.ne.s32.totalorder %s1479_s10, %s970_s7  ;;  %p975_p9 = scmp.lt.u32.totalorder %s1479_s10, %s1609_s4 }
 0x126   : > { %p976_p6 = scmp.lt.u32.totalorder %s974_s21, %s970_s7  ;;  %p978_p5 = scmp.lt.u32.totalorder %s970_s7, %s1479_s10 }
 0x127   : > { %p972_p4 = pnand %p971_p12, %p1641_p0 }
 0x128   : > { %p977_p13 = por %p976_p6, %p975_p9 }
 0x129   : > { %p973_p11 = pneg %p972_p4 }
 0x12a   : > { %p979_p1 = por %p978_p5, %p977_p13 }
 0x12c   : > { %p980_p7 = pnand %p979_p1, %p973_p11 }
 0x12e   : > { %983 = shalt.err (!%p980_p7)
}
 0x12f   : > { %767 = dma.vmem_to_hbm [thread:$0]  (%p1641_p0), %s1482_s26, 16, %s1479_s10, %s1490_s25  }
 0x130   : > { %s555_s29 = sshll.u32 %s1399_s16, 4  ;;  %s1519_s6 = scalar_lea.hbm %s1610_s5, %s1473_s30  ;;  %s1521_s29 = int_to_ptr.vmem [resolvable:$true] %s555_s29 }
 0x131   : > { %s581_s7 = sshll.u32 %s1405_s27, 4  ;;  %s535_s24 = scalar_lea.sflag [#allocation6], %s1396_s0  ;;  %s582_s7 = int_to_ptr.vmem [resolvable:$true] %s581_s7 }
 0x132   : > { %s984_s23 = scalar_lea.vmem %s1521_s29, 16  ;;  %s1148_s21 = smov [#allocation9]  }
 0x133   : > { %p985_p8 = scmp.ne.s32.totalorder %s1521_s29, %s984_s23  ;;  %s988_s10 = sshll.u32 %s1148_s21, 4  ;;  %s989_s10 = int_to_ptr.vmem [resolvable:$false] %s988_s10 }
 0x134   : > { %s990_s16 = scalar_lea.vmem %s989_s10, 32  ;;  %p991_p10 = scmp.lt.s32.totalorder %s1521_s29, %s989_s10 }
 0x135   : > { %p986_p2 = pnand %p985_p8, %p1641_p0  ;;  %p992_p12 = scmp.lt.s32.totalorder %s990_s16, %s984_s23 }
 0x137   : > { %p987_p3 = pneg %p986_p2  ;;  %p993_p4 = por %p992_p12, %p991_p10 }
 0x139   : > { %p994_p11 = pnand %p993_p4, %p987_p3 }
 0x13b   : > { %997 = shalt.err (!%p994_p11)
}
 0x13c   : > { %s998_s0 = scalar_lea.hbm %s1488_s15, 16  ;;  %s1002_s13 = scalar_lea.hbm %s1608_s3, 32 }
 0x13d   : > { %p999_p9 = scmp.ne.s32.totalorder %s1488_s15, %s998_s0  ;;  %p1003_p5 = scmp.lt.u32.totalorder %s1488_s15, %s1608_s3 }
 0x13e   : > { %p1004_p1 = scmp.lt.u32.totalorder %s1002_s13, %s998_s0  ;;  %p1006_p8 = scmp.lt.u32.totalorder %s998_s0, %s1488_s15 }
 0x13f   : > { %p1000_p6 = pnand %p999_p9, %p1641_p0 }
 0x140   : > { %p1005_p7 = por %p1004_p1, %p1003_p5 }
 0x141   : > { %p1001_p13 = pneg %p1000_p6 }
 0x142   : > { %p1007_p2 = por %p1006_p8, %p1005_p7 }
 0x144   : > { %p1008_p3 = pnand %p1007_p2, %p1001_p13 }
 0x146   : > { %1011 = shalt.err (!%p1008_p3)
}
 0x147   : > { %766 = dma.vmem_to_hbm [thread:$0]  (%p1641_p0), %s1521_s29, 16, %s1488_s15, %s535_s24  }
 0x148   : > { %s1012_s9 = scalar_lea.vmem %s582_s7, 16  ;;  %s1149_s23 = smov [#allocation12]  }
 0x149   : > { %p1013_p10 = scmp.ne.s32.totalorder %s582_s7, %s1012_s9  ;;  %s1016_s21 = sshll.u32 %s1149_s23, 4  ;;  %s1017_s21 = int_to_ptr.vmem [resolvable:$false] %s1016_s21 }
 0x14a   : > { %s1018_s10 = scalar_lea.vmem %s1017_s21, 32  ;;  %p1019_p11 = scmp.lt.s32.totalorder %s582_s7, %s1017_s21 }
 0x14b   : > { %p1014_p12 = pnand %p1013_p10, %p1641_p0  ;;  %p1020_p9 = scmp.lt.s32.totalorder %s1018_s10, %s1012_s9 }
 0x14d   : > { %p1015_p4 = pneg %p1014_p12  ;;  %p1021_p6 = por %p1020_p9, %p1019_p11 }
 0x14f   : > { %p1022_p13 = pnand %p1021_p6, %p1015_p4 }
 0x151   : > { %1025 = shalt.err (!%p1022_p13)
}
 0x152   : > { %s1026_s27 = scalar_lea.hbm %s1519_s6, 16  ;;  %s1030_s24 = scalar_lea.hbm %s1610_s5, 32 }
 0x153   : > { %p1027_p5 = scmp.ne.s32.totalorder %s1519_s6, %s1026_s27  ;;  %p1031_p8 = scmp.lt.u32.totalorder %s1519_s6, %s1610_s5 }
 0x154   : > { %p1032_p2 = scmp.lt.u32.totalorder %s1030_s24, %s1026_s27  ;;  %p1034_p10 = scmp.lt.u32.totalorder %s1026_s27, %s1519_s6 }
 0x155   : > { %p1028_p1 = pnand %p1027_p5, %p1641_p0 }
 0x156   : > { %p1033_p3 = por %p1032_p2, %p1031_p8 }
 0x157   : > { %p1029_p7 = pneg %p1028_p1 }
 0x158   : > { %p1035_p12 = por %p1034_p10, %p1033_p3 }
 0x15a   : > { %p1036_p4 = pnand %p1035_p12, %p1029_p7 }
 0x15c   : > { %1039 = shalt.err (!%p1036_p4)
}
 0x15d   : > { %768 = dma.vmem_to_hbm [thread:$0]  (%p1641_p0), %s582_s7, 16, %s1519_s6, %s1490_s25  }
 0x15e PF: > { %p790_p11 = scmp.ge.s32.totalorder %s1142_s28, 2  ;;  %s593_s30 = sand.u32 1, %s1102_s18  }
 0x15f   : > { %p1642_p9 = scmp.ne.s32.totalorder %s1631_s14, 0  ;;  %s594_s26 = scalar_lea.sflag [#allocation6], %s593_s30 }
 0x161   : > { %p780_p6 = pnand %p790_p11, %p1642_p9 }
 0x163   : > { %1093 = dma.done.wait (!%p780_p6), %s594_s26, 16  }
 0x164   : > { %1095 = vsyncadd (!%p780_p6), %s594_s26, 4294967280  ;;  %s1643_s13 = sadd.s32 4294967294, %s1142_s28  }
 0x165   : > { %s601_s11 = sand.u32 1, %s1643_s13  }
 0x166   : > { %s602_s8 = scalar_lea.sflag [#allocation11], %s601_s11 }
 0x167   : > { %1097 = dma.done.wait (!%p780_p6), %s602_s8, 32  }
 0x168   : > { %1099 = vsyncadd (!%p780_p6), %s602_s8, 4294967264  ;;  %s28_s28 = sadd.s32 1, %s1142_s28   ;;  %s1644_s12 = sld [smem:[#allocation17_spill]] }
 0x169   : > { %p25_p0 = scmp.ge.s32.totalorder %s28_s28, 6   ;;  %s1645_s23 = sld [smem:[#allocation22_spill]] }
 0x16a   : > { %s1646_s24 = sld [smem:[#allocation18_spill]]  ;;  %s1647_s25 = sld [smem:[#allocation19_spill]] }
 0x16b   : > { %s1648_s26 = sld [smem:[#allocation20_spill]]  ;;  %s1649_s27 = sld [smem:[#allocation21_spill]] }
 0x16c   : > { %s1650_s18 = smov %s1106_s19  ;;  %s1651_s19 = smov %s1110_s20 }
 0x16d   : > { %s1652_s20 = smov %s1271_s17  ;;  %s1653_s21 = smov %s1118_s22 }
 0x16e   : > { %s1654_s22 = smov %s1644_s12  ;;  %27 = sbr.rel (!%p25_p0) target bundleno = 15 (0xf), region = 134 }
 0x175   :  { %614 = vsyncpa [#allocation5], 1 }
 0x176   :  { %616 = vsyncpa [#allocation5 + $0x1], 1 }
 0x177   :  { %617 = vsyncpa [#allocation8], 1 }
 0x178   :  { %619 = vsyncpa [#allocation8 + $0x1], 1 }
 0x179   :  { %620 = vsyncpa [#allocation6], 1 }
 0x17a   :  { %622 = vsyncpa [#allocation6 + $0x1], 1 }
 0x17b   :  { %623 = vsyncpa [#allocation11], 1 }
 0x17c   :  { %625 = vsyncpa [#allocation11 + $0x1], 1 }

</bundles_post_ra>
